<compile_context>
chip_gen: v6e
topology: v6e:2x2x1
jax: 0.10.0
libtpu: 0.0.40
codegen_flags: <defaults>
</compile_context>

<pallas_src>
import math

import jax
import jax.numpy as jnp
from jax.experimental import pallas as pl
from jax.experimental.pallas import tpu as pltpu


# ----------------------------------------------------------------------------
# Pallas kernel
# ----------------------------------------------------------------------------
def _semiseparable_kernel(u_ref, wcs_ref, wcu_ref, was_ref, wau_ref, bias_ref,
                          y_ref):
    """Chunked causal + anticausal state-space recursion for one batch tile.

    u_ref    : (nch, TB, cio)      chunk-major input slabs (weights_dtype)
    wcs_ref  : (nch, S,   cio+S)   causal fused-chunk matrix, state rows
    wcu_ref  : (nch, cio, cio+S)   causal fused-chunk matrix, input rows
    was_ref  : (nch, S,   cio+S)   anticausal, state rows
    wau_ref  : (nch, cio, cio+S)   anticausal, input rows
    bias_ref : (1, input_size)     f32
    y_ref    : (TB, input_size)    f32 output tile, bias-initialised, accumulated in place

    Row-major batch convention per chunk:
        [y_chunk | state_out] = u_chunk @ Wu + state_in @ Ws
    y_chunk sits at lane offset 0 (lane-dense accumulation into y_ref); the tiny
    (TB, S) state tail is the only narrow slice.
    """
    nch, tb, cio = u_ref.shape
    sdim = wcs_ref.shape[1]
    wdt = wcs_ref.dtype
    f32 = jnp.float32

    # Output tile starts as the broadcast bias; chunk slices accumulate directly
    # into it (no accumulator scratch, no final bias pass).
    y_ref[...] = jnp.broadcast_to(bias_ref[...], y_ref.shape)

    cstate = jnp.zeros((tb, sdim), f32)   # causal state, carried in vregs (f32)
    astate = jnp.zeros((tb, sdim), f32)   # anticausal state

    # TODO(synk): switch to lax.fori_loop with dynamic leading-axis indexing if
    # nch ever exceeds ~16; with MXU-sized chunks nch stays small, so the static
    # unroll keeps code size and vreg pressure bounded.
    for c in range(nch):
        ca = nch - 1 - c

        # Causal sweep, chunk c (ascending).  The wide u @ Wu dot is independent
        # of the recurrent state, so only the small state @ Ws dot is serial.
        rc = jnp.dot(u_ref[c], wcu_ref[c], preferred_element_type=f32)
        rc += jnp.dot(cstate.astype(wdt), wcs_ref[c], preferred_element_type=f32)
        y_ref[:, c * cio:(c + 1) * cio] += rc[:, :cio]
        cstate = rc[:, cio:]

        # Anticausal sweep, chunk ca (chunks processed high -> low).
        ra = jnp.dot(u_ref[ca], wau_ref[ca], preferred_element_type=f32)
        ra += jnp.dot(astate.astype(wdt), was_ref[ca], preferred_element_type=f32)
        y_ref[:, ca * cio:(ca + 1) * cio] += ra[:, :cio]
        astate = ra[:, cio:]


# ----------------------------------------------------------------------------
# Wrapper helpers: chunked weight fusion, tile sizing
# ----------------------------------------------------------------------------
def _choose_chunk_stages(nb_states, sdim, io, target_fused=256):
    """Largest divisor g of nb_states with S + g*io <= target_fused, preferring
    chunks whose input width g*io is a multiple of 128 (lane-aligned y stores)."""
    best, best_aligned = 1, None
    for g in range(1, nb_states + 1):
        if nb_states % g or sdim + g * io > target_fused:
            continue
        best = g
        if (g * io) % 128 == 0:
            best_aligned = g
    return best_aligned if best_aligned is not None else best


def _build_chunk_weights(params, chunk, weights_dtype):
    """Pre-compose `chunk` consecutive stages into fused per-chunk matrices.

    Row-major batch convention:  [y_chunk | state_out] = state_in @ Ws + u_chunk @ Wu
    Composition runs in f32 (bf16 rounding only happens once per chunk boundary
    in the kernel, not once per stage).  In a real model these stacks would be
    computed once and cached, not rebuilt per forward call.
    """
    A, B, C, D, E, F, G, _bias = params
    nb_states, sdim, io = B.shape
    nch = nb_states // chunk
    cio = chunk * io

    def causal_chunk(c):
        xs = jnp.eye(sdim, dtype=jnp.float32)        # state_in -> state coefficients
        xu = jnp.zeros((cio, sdim), jnp.float32)     # u_chunk  -> state coefficients
        ys, yu = [], []
        for r in range(chunk):
            k = c * chunk + r
            sl = slice(r * io, (r + 1) * io)
            ys.append(xs @ C[k].T)                                   # (S,   io)
            yu.append((xu @ C[k].T).at[sl, :].add(D[k].T))           # (cio, io)
            xu = (xu @ A[k].T).at[sl, :].add(B[k].T)
            xs = xs @ A[k].T
        return (jnp.concatenate(ys + [xs], axis=1),   # Ws: (S,   cio+S)
                jnp.concatenate(yu + [xu], axis=1))   # Wu: (cio, cio+S)

    def anticausal_chunk(c):
        xs = jnp.eye(sdim, dtype=jnp.float32)
        xu = jnp.zeros((cio, sdim), jnp.float32)
        ys, yu = [None] * chunk, [None] * chunk
        for r in range(chunk - 1, -1, -1):            # stages processed high -> low
            k = c * chunk + r
            sl = slice(r * io, (r + 1) * io)
            ys[r] = xs @ G[k].T
            yu[r] = xu @ G[k].T
            xu = (xu @ E[k].T).at[sl, :].add(F[k].T)
            xs = xs @ E[k].T
        return (jnp.concatenate(ys + [xs], axis=1),
                jnp.concatenate(yu + [xu], axis=1))

    wcs, wcu, was, wau = [], [], [], []
    for c in range(nch):
        ws, wu = causal_chunk(c)
        wcs.append(ws)
        wcu.append(wu)
        ws, wu = anticausal_chunk(c)
        was.append(ws)
        wau.append(wu)
    stack = lambda mats: jnp.stack(mats).astype(weights_dtype)
    return stack(wcs), stack(wcu), stack(was), stack(wau)


def _vmem_capacity_bytes():
    # Fall back to the most conservative generation (v7x: 64 MiB / TC).
    try:
        return int(pltpu.get_tpu_info().vmem_capacity_bytes)
    except Exception:
        return 64 * 1024 * 1024


def _choose_batch_tile(batch, input_size, nch, fused, wbytes, vmem_cap):
    """Pick a batch tile that (a) fits the double-buffered U/out blocks plus the
    VMEM-resident weight stacks in ~60% of this generation's VMEM and (b) keeps
    >= 2 grid steps when the batch allows it, so the "parallel" axis can shard
    across v7x's two TensorCores."""
    weight_bytes = 2 * 2 * nch * fused * fused * wbytes + 2 * input_size * 4
    budget = int(0.6 * vmem_cap) - weight_bytes
    per_row = 2 * input_size * (wbytes + 4)          # double-buffered u + f32 out
    tile = 1024 if vmem_cap >= (96 << 20) else 256   # 128 MiB parts vs v7x 64 MiB
    while tile > 8 and tile * per_row > budget:
        tile //= 2
    tile = max(tile, 8)
    if 16 <= batch <= tile:                          # force >= 2 grid steps (v7x 2 TCs)
        tile = ((batch + 1) // 2 + 7) // 8 * 8
    return tile


# ----------------------------------------------------------------------------
# Wrapper: chunked, batch-tiled pallas_call
# ----------------------------------------------------------------------------
def semiseparable_forward(U, params, *, statespace_dim, inputoutput_dim,
                          batch_tile=None, weights_dtype=jnp.bfloat16,
                          target_fused=256):
    """U: (batch, input_size) float32 -> (batch, input_size) float32.

    weights_dtype defaults to bfloat16 (full-rate MXU, half the weight/U DMA);
    accumulation stays f32.  Pass jnp.float32 to match the reference to ~1e-6.
    """
    bias = params[7]
    batch, input_size = U.shape
    io = inputoutput_dim
    sdim = statespace_dim
    assert input_size % io == 0
    nb_states = input_size // io

    # Chunk g consecutive stages so the fused contraction dim (S + g*io) is
    # close to the MXU width and the per-chunk u/y slabs are lane-dense.
    chunk = _choose_chunk_stages(nb_states, sdim, io, target_fused)
    nch = nb_states // chunk
    cio = chunk * io
    fused = cio + sdim

    wcs, wcu, was, wau = _build_chunk_weights(params, chunk, weights_dtype)
    bias2d = bias.reshape(1, input_size).astype(jnp.float32)

    wbytes = jnp.dtype(weights_dtype).itemsize
    vmem_cap = _vmem_capacity_bytes()
    if batch_tile is None:
        batch_tile = _choose_batch_tile(batch, input_size, nch, fused, wbytes,
                                        vmem_cap)

    if batch <= batch_tile:
        tb = bp = batch                        # full-extent block: no 8-multiple needed
    else:
        tb = max(8, (batch_tile // 8) * 8)     # second-to-last block dim: multiple of 8
        bp = pl.cdiv(batch, tb) * tb
    if bp != batch:
        U = jnp.pad(U, ((0, bp - batch), (0, 0)))

    # Chunk-major, lane-dense input slabs: (nch, bp, cio); cast once for the MXU.
    u3 = jnp.transpose(U.reshape(bp, nch, cio), (1, 0, 2)).astype(weights_dtype)

    out = pl.pallas_call(
        _semiseparable_kernel,
        out_shape=jax.ShapeDtypeStruct((bp, input_size), jnp.float32),
        grid_spec=pltpu.PrefetchScalarGridSpec(
            num_scalar_prefetch=0,
            grid=(bp // tb,),
            in_specs=[
                pl.BlockSpec((nch, tb, cio), lambda i: (0, i, 0)),       # U chunks
                # Grid-invariant weight stacks: constant index_map => fetched once
                # and kept VMEM-resident by the auto-pipeline.
                # TODO(synk): single-buffer them (pl.Buffered(1) pipeline_mode) to
                # halve their VMEM footprint once that path is available here.
                pl.BlockSpec((nch, sdim, fused), lambda i: (0, 0, 0)),   # causal Ws
                pl.BlockSpec((nch, cio, fused), lambda i: (0, 0, 0)),    # causal Wu
                pl.BlockSpec((nch, sdim, fused), lambda i: (0, 0, 0)),   # anticausal Ws
                pl.BlockSpec((nch, cio, fused), lambda i: (0, 0, 0)),    # anticausal Wu
                pl.BlockSpec((1, input_size), lambda i: (0, 0)),         # bias
            ],
            out_specs=pl.BlockSpec((tb, input_size), lambda i: (i, 0)),
        ),
        compiler_params=pltpu.CompilerParams(
            dimension_semantics=("parallel",),
            vmem_limit_bytes=int(0.75 * vmem_cap)),
    )(u3, wcs, wcu, was, wau, bias2d)

    return out[:batch]


# ----------------------------------------------------------------------------
# Deterministic parameter init (glorot-uniform, mirroring the module shapes)
# ----------------------------------------------------------------------------
def _glorot(key, stacked_shape):
    per_stage = stacked_shape[-2:]
    limit = math.sqrt(6.0 / sum(per_stage))
    return jax.random.uniform(key, stacked_shape, jnp.float32, -limit, limit)


def init_params(key, input_size, statespace_dim, inputoutput_dim):
    nb_states = input_size // inputoutput_dim
    S, io, N = statespace_dim, inputoutput_dim, nb_states
    ks = jax.random.split(key, 8)
    A = _glorot(ks[0], (N, S, S))
    B = _glorot(ks[1], (N, S, io))
    C = _glorot(ks[2], (N, io, S))
    D = _glorot(ks[3], (N, io, io))
    E = _glorot(ks[4], (N, S, S))
    F = _glorot(ks[5], (N, S, io))
    G = _glorot(ks[6], (N, io, S))
    limit_b = math.sqrt(6.0 / input_size)
    bias = jax.random.uniform(ks[7], (input_size,), jnp.float32, -limit_b, limit_b)
    return A, B, C, D, E, F, G, bias


# ----------------------------------------------------------------------------
# Pure-JAX reference (literal translation of the PyTorch forward)
# ----------------------------------------------------------------------------
def reference_forward(U, params, *, statespace_dim, inputoutput_dim):
    A, B, C, D, E, F, G, bias = params
    batch, input_size = U.shape
    io = inputoutput_dim
    nb_states = input_size // io
    Ut = U.T

    causal_state = jnp.zeros((statespace_dim, batch), jnp.float32)
    anticausal_state = jnp.zeros((statespace_dim, batch), jnp.float32)
    y_pred = jnp.zeros((input_size, batch), jnp.float32)

    for k in range(nb_states):
        rng_c = slice(k * io, (k + 1) * io)
        u_c = Ut[rng_c, :]
        y_pred = y_pred.at[rng_c, :].add(C[k] @ causal_state + D[k] @ u_c)
        causal_state = A[k] @ causal_state + B[k] @ u_c

        j = nb_states - 1 - k
        rng_a = slice(j * io, (j + 1) * io)
        u_a = Ut[rng_a, :]
        y_pred = y_pred.at[rng_a, :].add(G[j] @ anticausal_state)
        anticausal_state = E[j] @ anticausal_state + F[j] @ u_a

    return y_pred.T + bias


# ----------------------------------------------------------------------------
if __name__ == "__main__":
    batch = 2
    input_size = 16
    statespace_dim = 4
    inputoutput_dim = 2

    key = jax.random.PRNGKey(0)
    k_u, k_p = jax.random.split(key)
    U = jax.random.normal(k_u, (batch, input_size), jnp.float32)
    params = init_params(k_p, input_size, statespace_dim, inputoutput_dim)

    y_ref = reference_forward(
        U, params, statespace_dim=statespace_dim, inputoutput_dim=inputoutput_dim)

    # f32 weights: matches the per-stage reference up to f32 re-association error.
    y_f32 = jax.block_until_ready(semiseparable_forward(
        U, params, statespace_dim=statespace_dim, inputoutput_dim=inputoutput_dim,
        weights_dtype=jnp.float32))
    assert y_f32.shape == (batch, input_size)
    assert jnp.allclose(y_f32, y_ref, atol=5e-5, rtol=5e-5), "f32 mismatch vs reference"

    # Default bf16 weights/inputs (f32 accumulation): looser tolerance.
    y_bf16 = jax.block_until_ready(semiseparable_forward(
        U, params, statespace_dim=statespace_dim, inputoutput_dim=inputoutput_dim))
    assert y_bf16.shape == (batch, input_size)
    assert jnp.allclose(y_bf16, y_ref, atol=5e-2, rtol=5e-2), "bf16 mismatch vs reference"

    print("KERNEL_OK")
</pallas_src>

<mosaic_0001>
module attributes {stable_mosaic.version = 11 : i64} {
  func.func @_semiseparable_kernel(%arg0: i32, %arg1: memref<1x2x16xf32, #tpu.memory_space<vmem>>, %arg2: memref<1x4x20xf32, #tpu.memory_space<vmem>>, %arg3: memref<1x16x20xf32, #tpu.memory_space<vmem>>, %arg4: memref<1x4x20xf32, #tpu.memory_space<vmem>>, %arg5: memref<1x16x20xf32, #tpu.memory_space<vmem>>, %arg6: memref<1x16xf32, #tpu.memory_space<vmem>>, %arg7: memref<2x16xf32, #tpu.memory_space<vmem>>) attributes {dimension_semantics = [#tpu.dimension_semantics<parallel>], iteration_bounds = array<i64: 1>, scalar_prefetch = 0 : i64, scratch_operands = 0 : i64, tpu.core_type = #tpu.core_type<tc>, window_params = [{transform_indices = @transform_0, window_bounds = array<i64: 1, 2, 16>}, {pipeline_mode = #tpu.pipeline_mode<synchronous>, transform_indices = @transform_1, window_bounds = array<i64: 1, 4, 20>}, {pipeline_mode = #tpu.pipeline_mode<synchronous>, transform_indices = @transform_2, window_bounds = array<i64: 1, 16, 20>}, {pipeline_mode = #tpu.pipeline_mode<synchronous>, transform_indices = @transform_3, window_bounds = array<i64: 1, 4, 20>}, {pipeline_mode = #tpu.pipeline_mode<synchronous>, transform_indices = @transform_4, window_bounds = array<i64: 1, 16, 20>}, {pipeline_mode = #tpu.pipeline_mode<synchronous>, transform_indices = @transform_5, window_bounds = array<i64: 1, 16>}, {transform_indices = @transform_6, window_bounds = array<i64: 2, 16>}]} {
    %c0 = arith.constant 0 : index
    %c0_0 = arith.constant 0 : index
    %0 = vector.load %arg6[%c0, %c0_0] : memref<1x16xf32, #tpu.memory_space<vmem>>, vector<1x16xf32>
    %1 = vector.shape_cast %0 : vector<1x16xf32> to vector<1x16xf32>
    %2 = vector.broadcast %1 : vector<1x16xf32> to vector<2x16xf32>
    %c0_1 = arith.constant 0 : index
    %c0_2 = arith.constant 0 : index
    %3 = vector.load %arg7[%c0_1, %c0_2] : memref<2x16xf32, #tpu.memory_space<vmem>>, vector<2x16xf32>
    tpu.vector_store %arg7[%c0_1, %c0_2], %2 {strides = array<i32>} : memref<2x16xf32, #tpu.memory_space<vmem>>, vector<2x16xf32>,
    %cst = arith.constant 0.000000e+00 : f32
    %4 = vector.broadcast %cst : f32 to vector<2x4xf32>
    %cst_3 = arith.constant 0.000000e+00 : f32
    %5 = vector.broadcast %cst_3 : f32 to vector<2x4xf32>
    %c0_4 = arith.constant 0 : index
    %c0_5 = arith.constant 0 : index
    %c0_6 = arith.constant 0 : index
    %6 = vector.load %arg1[%c0_4, %c0_5, %c0_6] : memref<1x2x16xf32, #tpu.memory_space<vmem>>, vector<1x2x16xf32>
    %7 = vector.shape_cast %6 : vector<1x2x16xf32> to vector<2x16xf32>
    %c0_7 = arith.constant 0 : index
    %c0_8 = arith.constant 0 : index
    %c0_9 = arith.constant 0 : index
    %8 = vector.load %arg3[%c0_7, %c0_8, %c0_9] : memref<1x16x20xf32, #tpu.memory_space<vmem>>, vector<1x16x20xf32>
    %9 = vector.shape_cast %8 : vector<1x16x20xf32> to vector<16x20xf32>
    %cst_10 = arith.constant dense<0.000000e+00> : vector<2x20xf32>
    %10 = tpu.matmul %7, %9, %cst_10 {dimension_numbers = #tpu.dot_dimension_numbers<[1], [0], [0], [1], [0, 0, 1, 1], [], []>} : vector<2x16xf32>, vector<16x20xf32>, vector<2x20xf32> -> vector<2x20xf32>
    %c0_11 = arith.constant 0 : index
    %c0_12 = arith.constant 0 : index
    %c0_13 = arith.constant 0 : index
    %11 = vector.load %arg2[%c0_11, %c0_12, %c0_13] : memref<1x4x20xf32, #tpu.memory_space<vmem>>, vector<1x4x20xf32>
    %12 = vector.shape_cast %11 : vector<1x4x20xf32> to vector<4x20xf32>
    %cst_14 = arith.constant dense<0.000000e+00> : vector<2x20xf32>
    %13 = tpu.matmul %4, %12, %cst_14 {dimension_numbers = #tpu.dot_dimension_numbers<[1], [0], [0], [1], [0, 0, 1, 1], [], []>} : vector<2x4xf32>, vector<4x20xf32>, vector<2x20xf32> -> vector<2x20xf32>
    %14 = arith.addf %10, %13 : vector<2x20xf32>
    %c0_15 = arith.constant 0 : index
    %c0_16 = arith.constant 0 : index
    %15 = vector.load %arg7[%c0_15, %c0_16] : memref<2x16xf32, #tpu.memory_space<vmem>>, vector<2x16xf32>
    %16 = vector.extract_strided_slice %14 {offsets = [0, 0], sizes = [2, 16], strides = [1, 1]} : vector<2x20xf32> to vector<2x16xf32>
    %17 = arith.addf %15, %16 : vector<2x16xf32>
    %c0_17 = arith.constant 0 : index
    %c0_18 = arith.constant 0 : index
    %18 = vector.load %arg7[%c0_17, %c0_18] : memref<2x16xf32, #tpu.memory_space<vmem>>, vector<2x16xf32>
    tpu.vector_store %arg7[%c0_17, %c0_18], %17 {strides = array<i32>} : memref<2x16xf32, #tpu.memory_space<vmem>>, vector<2x16xf32>,
    %c0_19 = arith.constant 0 : index
    %c0_20 = arith.constant 0 : index
    %c0_21 = arith.constant 0 : index
    %19 = vector.load %arg1[%c0_19, %c0_20, %c0_21] : memref<1x2x16xf32, #tpu.memory_space<vmem>>, vector<1x2x16xf32>
    %20 = vector.shape_cast %19 : vector<1x2x16xf32> to vector<2x16xf32>
    %c0_22 = arith.constant 0 : index
    %c0_23 = arith.constant 0 : index
    %c0_24 = arith.constant 0 : index
    %21 = vector.load %arg5[%c0_22, %c0_23, %c0_24] : memref<1x16x20xf32, #tpu.memory_space<vmem>>, vector<1x16x20xf32>
    %22 = vector.shape_cast %21 : vector<1x16x20xf32> to vector<16x20xf32>
    %cst_25 = arith.constant dense<0.000000e+00> : vector<2x20xf32>
    %23 = tpu.matmul %20, %22, %cst_25 {dimension_numbers = #tpu.dot_dimension_numbers<[1], [0], [0], [1], [0, 0, 1, 1], [], []>} : vector<2x16xf32>, vector<16x20xf32>, vector<2x20xf32> -> vector<2x20xf32>
    %c0_26 = arith.constant 0 : index
    %c0_27 = arith.constant 0 : index
    %c0_28 = arith.constant 0 : index
    %24 = vector.load %arg4[%c0_26, %c0_27, %c0_28] : memref<1x4x20xf32, #tpu.memory_space<vmem>>, vector<1x4x20xf32>
    %25 = vector.shape_cast %24 : vector<1x4x20xf32> to vector<4x20xf32>
    %cst_29 = arith.constant dense<0.000000e+00> : vector<2x20xf32>
    %26 = tpu.matmul %5, %25, %cst_29 {dimension_numbers = #tpu.dot_dimension_numbers<[1], [0], [0], [1], [0, 0, 1, 1], [], []>} : vector<2x4xf32>, vector<4x20xf32>, vector<2x20xf32> -> vector<2x20xf32>
    %27 = arith.addf %23, %26 : vector<2x20xf32>
    %c0_30 = arith.constant 0 : index
    %c0_31 = arith.constant 0 : index
    %28 = vector.load %arg7[%c0_30, %c0_31] : memref<2x16xf32, #tpu.memory_space<vmem>>, vector<2x16xf32>
    %29 = vector.extract_strided_slice %27 {offsets = [0, 0], sizes = [2, 16], strides = [1, 1]} : vector<2x20xf32> to vector<2x16xf32>
    %30 = arith.addf %28, %29 : vector<2x16xf32>
    %c0_32 = arith.constant 0 : index
    %c0_33 = arith.constant 0 : index
    %31 = vector.load %arg7[%c0_32, %c0_33] : memref<2x16xf32, #tpu.memory_space<vmem>>, vector<2x16xf32>
    tpu.vector_store %arg7[%c0_32, %c0_33], %30 {strides = array<i32>} : memref<2x16xf32, #tpu.memory_space<vmem>>, vector<2x16xf32>,
    return
  }
  func.func @transform_0(%arg0: i32) -> (i32, i32, i32) {
    %c0_i32 = arith.constant 0 : i32
    %c0_i32_0 = arith.constant 0 : i32
    %c0_i32_1 = arith.constant 0 : i32
    return %c0_i32, %arg0, %c0_i32_0 : i32, i32, i32
  }
  func.func @transform_1(%arg0: i32) -> (i32, i32, i32) {
    %c0_i32 = arith.constant 0 : i32
    %c0_i32_0 = arith.constant 0 : i32
    %c0_i32_1 = arith.constant 0 : i32
    %c0_i32_2 = arith.constant 0 : i32
    return %c0_i32, %c0_i32_0, %c0_i32_1 : i32, i32, i32
  }
  func.func @transform_2(%arg0: i32) -> (i32, i32, i32) {
    %c0_i32 = arith.constant 0 : i32
    %c0_i32_0 = arith.constant 0 : i32
    %c0_i32_1 = arith.constant 0 : i32
    %c0_i32_2 = arith.constant 0 : i32
    return %c0_i32, %c0_i32_0, %c0_i32_1 : i32, i32, i32
  }
  func.func @transform_3(%arg0: i32) -> (i32, i32, i32) {
    %c0_i32 = arith.constant 0 : i32
    %c0_i32_0 = arith.constant 0 : i32
    %c0_i32_1 = arith.constant 0 : i32
    %c0_i32_2 = arith.constant 0 : i32
    return %c0_i32, %c0_i32_0, %c0_i32_1 : i32, i32, i32
  }
  func.func @transform_4(%arg0: i32) -> (i32, i32, i32) {
    %c0_i32 = arith.constant 0 : i32
    %c0_i32_0 = arith.constant 0 : i32
    %c0_i32_1 = arith.constant 0 : i32
    %c0_i32_2 = arith.constant 0 : i32
    return %c0_i32, %c0_i32_0, %c0_i32_1 : i32, i32, i32
  }
  func.func @transform_5(%arg0: i32) -> (i32, i32) {
    %c0_i32 = arith.constant 0 : i32
    %c0_i32_0 = arith.constant 0 : i32
    %c0_i32_1 = arith.constant 0 : i32
    return %c0_i32, %c0_i32_0 : i32, i32
  }
  func.func @transform_6(%arg0: i32) -> (i32, i32) {
    %c0_i32 = arith.constant 0 : i32
    %c0_i32_0 = arith.constant 0 : i32
    return %arg0, %c0_i32 : i32, i32
  }
}

</mosaic_0001>

<bundles_post_ra>
// kernel: tpu_custom_call.1
= control target key start
LH: loop header
LB: loop body
LE: loop exit
PB: predicated region body
PF: predicated region fallthrough
CT: control target
= control target key end

     0   :  { %11 = vsyncpa [#allocation3], 0  ;;  %s645_s0 = inlined_call_operand.hbm [shape: f32[1,2,16], index: 0, kind: input, shape index: {}]   ;;  %s646_s1 = inlined_call_operand.hbm [shape: f32[1,4,20], index: 1, kind: input, shape index: {}]   ;;  %s647_s2 = inlined_call_operand.hbm [shape: f32[1,16,20], index: 2, kind: input, shape index: {}]   ;;  %s648_s3 = inlined_call_operand.vmem [shape: f32[1,4,20], index: 3, kind: input, shape index: {}]   ;;  %s649_s4 = inlined_call_operand.hbm [shape: f32[1,16,20], index: 4, kind: input, shape index: {}]   ;;  %s650_s5 = inlined_call_operand.vmem [shape: f32[1,16], index: 5, kind: input, shape index: {}]   ;;  %s651_s6 = inlined_call_operand.hbm [shape: f32[2,16], index: 6, kind: output, shape index: {}]  }
   0x1   :  { %12 = vsyncpa [#allocation6], 0 }
   0x2   :  { %13 = vsyncpa [#allocation9], 0 }
   0x3   :  { %14 = vsyncpa [#allocation4], 0  ;;  %s569_s21 = smov [#allocation5]   ;;  %s570_s23 = smov [#allocation2]  }
   0x4   :  { %s31_s22 = sshll.u32 %s569_s21, 4  ;;  %s21_s24 = sshll.u32 %s570_s23, 4  ;;  %s32_s22 = int_to_ptr.vmem [resolvable:$true] %s31_s22  ;;  %s22_s24 = int_to_ptr.vmem [resolvable:$true] %s21_s24 }
   0x5   :  { %s469_s25 = scalar_lea.vmem %s32_s22, 64  ;;  %p474_p1 = scmp.lt.s32.totalorder %s32_s22, %s32_s22 }
   0x6   :  { %p470_p0 = scmp.ne.s32.totalorder %s32_s22, %s469_s25  ;;  %p475_p2 = scmp.lt.s32.totalorder %s469_s25, %s469_s25 }
   0x8   :  { %p476_p3 = por %p475_p2, %p474_p1 }
   0xa   :  { %p477_p4 = pnand %p476_p3, %p470_p0 }
   0xc   :  { %480 = shalt.err (!%p477_p4)
}
   0xd   :  { %34 = dma.hbm_to_vmem [thread:$0]  %s646_s1, 64, %s32_s22, [#allocation6]  }
   0xe   :  { %s489_s28 = scalar_lea.vmem %s22_s24, 32  ;;  %p494_p6 = scmp.lt.s32.totalorder %s22_s24, %s22_s24 }
   0xf   :  { %p490_p5 = scmp.ne.s32.totalorder %s22_s24, %s489_s28  ;;  %p495_p7 = scmp.lt.s32.totalorder %s489_s28, %s489_s28 }
  0x11   :  { %p496_p8 = por %p495_p7, %p494_p6 }
  0x13   :  { %p497_p9 = pnand %p496_p8, %p490_p5 }
  0x15   :  { %500 = shalt.err (!%p497_p9)
}
  0x16   :  { %24 = dma.hbm_to_vmem [thread:$0]  %s645_s0, 32, %s22_s24, [#allocation3]  }
  0x17   :  { %s571_s7 = smov [#allocation7]  }
  0x18   :  { %s40_s8 = sshll.u32 %s571_s7, 4  ;;  %s41_s8 = int_to_ptr.vmem [resolvable:$true] %s40_s8 }
  0x19   :  { %s509_s9 = scalar_lea.vmem %s41_s8, 256  ;;  %p514_p11 = scmp.lt.s32.totalorder %s41_s8, %s41_s8 }
  0x1a   :  { %p510_p10 = scmp.ne.s32.totalorder %s41_s8, %s509_s9  ;;  %p515_p12 = scmp.lt.s32.totalorder %s509_s9, %s509_s9 }
  0x1c   :  { %p516_p13 = por %p515_p12, %p514_p11 }
  0x1e   :  { %p517_p0 = pnand %p516_p13, %p510_p10 }
  0x20   :  { %520 = shalt.err (!%p517_p0)
}
  0x21   :  { %s572_s1 = smov 128   ;;  %s573_s10 = smov 8  }
  0x22   :  { %46 = dma.hbm_to_vmem [thread:$0]  %s647_s2, 256, %s41_s8, [#allocation6], %s572_s1, %s572_s1, %s573_s10  }
  0x23   :  { %s574_s13 = smov [#allocation8]  }
  0x24   :  { %s54_s14 = sshll.u32 %s574_s13, 4  ;;  %s55_s14 = int_to_ptr.vmem [resolvable:$true] %s54_s14 }
  0x25   :  { %s529_s0 = scalar_lea.vmem %s55_s14, 256  ;;  %p534_p2 = scmp.lt.s32.totalorder %s55_s14, %s55_s14 }
  0x26   :  { %p530_p1 = scmp.ne.s32.totalorder %s55_s14, %s529_s0  ;;  %p535_p3 = scmp.lt.s32.totalorder %s529_s0, %s529_s0 }
  0x28   :  { %p536_p4 = por %p535_p3, %p534_p2 }
  0x2a   :  { %p537_p5 = pnand %p536_p4, %p530_p1 }
  0x2c   :  { %540 = shalt.err (!%p537_p5)
}
  0x2d   :  { %60 = dma.hbm_to_vmem [thread:$0]  %s649_s4, 256, %s55_s14, [#allocation9], %s572_s1, %s572_s1, %s573_s10  }
  0x2e   :  { %561 = dma.done.wait [#allocation3], 32  }
  0x2f   :  { %562 = vsyncadd [#allocation3], 4294967264 }
  0x30   :  { %563 = dma.done.wait [#allocation6], 320  }
  0x31   :  { %564 = vsyncadd [#allocation6], 4294966976 }
  0x32   :  { %565 = dma.done.wait [#allocation9], 256  }
  0x33   :  { %566 = vsyncadd [#allocation9], 4294967040  ;;  %v575_v0 = vmov 0.0   ;;  %vm576_vm0 = vmmov 0   ;;  %vm92_vm1 = vcmask 1043456   ;;  %v86_v2 = vld [vmem:[#allocation7 + $0x8] sm:$0xff] }
  0x34   :  { %428 = vmatprep.subr.mxu0 %v575_v0  ;;  %433 = vmatprep.subr.mxu1 %v575_v0  ;;  %v87_v1 = vld [vmem:[#allocation5] sm:$0xf]  ;;  %v85_v3 = vld [vmem:[#allocation7] sm:$0xff]  ;;  %v84_v4 = vld [vmem:[#allocation2] sm:$0x3]  ;;  %vm166_vm2 = vcmask 130048  }
  0x35   :  { %430 = vmatprep.mubr.msk.f32.mxu0 %vm576_vm0, %v575_v0  ;;  %437 = vmatprep.mubr.msk.f32.mxu1 %vm576_vm0, %v575_v0  ;;  %v245_v5 = vld [vmem:[#allocation8 + $0x8] sm:$0xff]  ;;  %v244_v7 = vld [vmem:[#allocation8] sm:$0xff]  ;;  %vm82_vm3 = vcmask 123904   ;;  %s577_s18 = smov [#allocation10]  }
  0x36   :  { %429 = vmatpush3.msk.msra.mxu0 %vm92_vm1, %v87_v1  ;;  %434 = vmatpush3.msra.mxu1 %v86_v2  ;;  %v246_v6 = vld [vmem:[%s648_s3] sm:$0xf]  ;;  %s402_s19 = sshll.u32 %s577_s18, 4  ;;  %s403_s19 = int_to_ptr.vmem [resolvable:$true] %s402_s19 }
  0x37   :  { %431 = vmatmul.mubr.f32.vlgmr.msra.gmra.mxu0 %v575_v0  ;;  %435 = vmatprep.subr.mxu1 %v575_v0  ;;  %v243_v8 = vld [vmem:[#allocation2] sm:$0x3]  ;;  %p546_p7 = scmp.lt.s32.totalorder %s403_s19, %s403_s19 }
  0x38   :  { %436 = vmatpush3.msra.mxu1 %v85_v3  ;;  %440 = vmatprep.subr.mxu0 %v575_v0  ;;  %v413_v9 = vld [vmem:[%s650_s5] ss:$0 sm:$0xff]  ;;  %s541_s5 = scalar_lea.vmem %s403_s19, 32 }
  0x39   :  { %438 = vmatmul.mubr.msk.f32.vlgmr.msra.gmra.mxu1 %vm166_vm2, %v84_v4  ;;  %445 = vmatprep.subr.mxu1 %v575_v0  ;;  %83 = vst.msk [vmem:[#allocation10] sm:$0x3] %vm82_vm3, %v413_v9  ;;  %p542_p6 = scmp.ne.s32.totalorder %s403_s19, %s541_s5  ;;  %p547_p8 = scmp.lt.s32.totalorder %s541_s5, %s541_s5 }
  0x3a   :  { %446 = vmatpush3.msra.mxu1 %v245_v5  ;;  %441 = vmatpush3.msk.msra.mxu0 %vm92_vm1, %v246_v6 }
  0x3b   :  { %447 = vmatprep.subr.mxu1 %v575_v0  ;;  %442 = vmatprep.mubr.msk.f32.mxu0 %vm576_vm0, %v575_v0  ;;  %p548_p9 = por %p547_p8, %p546_p7 }
  0x3c   :  { %448 = vmatpush3.msra.mxu1 %v244_v7  ;;  %449 = vmatprep.mubr.msk.f32.mxu1 %vm576_vm0, %v575_v0 }
  0x3d   :  { %443 = vmatmul.mubr.f32.vlgmr.msra.gmra.mxu0 %v575_v0  ;;  %450 = vmatmul.mubr.msk.f32.vlgmr.msra.gmra.mxu1 %vm166_vm2, %v243_v8  ;;  %p549_p10 = pnand %p548_p9, %p542_p6 }
  0x40   :  { %v240_v13 = vld [vmem:[#allocation10] sm:$0x3] }
  0xf7   :  { %v162_v10 = vpop.f32.mrf.mxu0 }
  0xf9   :  { %v432_v11 = vpop.f32.mrf.mxu0  ;;  %v236_v12 = vpop.f32.mrf.mxu1 }
  0xfa   :  { %v237_v14 = vadd.f32 %v236_v12, %v162_v10 }
  0xfb   :  { %v439_v15 = vpop.f32.mrf.mxu1 }
  0xfc   :  { %v241_v16 = vadd.f32 %v240_v13, %v237_v14 }
  0xfd   :  { %v316_v17 = vpop.f32.mrf.mxu0  ;;  %v389_v18 = vpop.f32.mrf.mxu1 }
  0xfe   :  { %242 = vst.msk [vmem:[#allocation10] sm:$0x3] %vm82_vm3, %v241_v16  ;;  %v390_v21 = vadd.f32 %v389_v18, %v316_v17 }
  0xff   :  { %v444_v19 = vpop.f32.mrf.mxu0  ;;  %v451_v20 = vpop.f32.mrf.mxu1 }
 0x105   :  { %v393_v22 = vld [vmem:[#allocation10] sm:$0x3] }
 0x106   :  { %v394_v23 = vadd.f32 %v393_v22, %v390_v21 }
 0x108   :  { %395 = vst.msk [vmem:[#allocation10] sm:$0x3] %vm82_vm3, %v394_v23 }
 0x109   :  { %552 = shalt.err (!%p549_p10)
}
 0x10a   :  { %405 = dma.vmem_to_hbm [thread:$0]  %s403_s19, 32, %s651_s6, [#allocation4]  }
 0x10b   :  { %567 = dma.done.wait [#allocation4], 32  }
 0x10c   :  { %568 = vsyncadd [#allocation4], 4294967264 }
 0x10d   :  { %409 = vsyncpa [#allocation3], 1 }
 0x10e   :  { %410 = vsyncpa [#allocation6], 1 }
 0x10f   :  { %411 = vsyncpa [#allocation9], 1 }
 0x110   :  { %412 = vsyncpa [#allocation4], 1 }

</bundles_post_ra>
